<compile_context>
chip_gen: v6e
topology: v6e:2x2x1
jax: 0.10.0
libtpu: 0.0.40
codegen_flags: <defaults>
</compile_context>

<pallas_src>
import math

import jax
import jax.numpy as jnp
from jax.experimental import pallas as pl
from jax.experimental.pallas import tpu as pltpu


def _round_up(x, m):
    return ((x + m - 1) // m) * m


def _cdiv(a, b):
    return -(-a // b)


def _vmem_capacity_bytes():
    """Physical VMEM per TensorCore; conservative 64 MiB (v7x) fallback."""
    try:
        return int(pltpu.get_tpu_info().vmem_capacity_bytes)
    except Exception:
        return 64 << 20


def _resident_spec(shape):
    """BlockSpec for a constant-index (VMEM-resident) operand.

    The index_map is constant so the block is DMA'd once; single-buffering it
    (pl.Buffered(1)) halves its VMEM footprint.
    """
    index_map = lambda i: (0,) * len(shape)
    try:
        return pl.BlockSpec(shape, index_map, pipeline_mode=pl.Buffered(1))
    except Exception:  # older jax without pipeline_mode support
        return pl.BlockSpec(shape, index_map)


def ae_forward_kernel(x_ref, we_ref, be_ref, wd_ref, bd_ref, wy_ref, by_ref,
                      xrec_ref, y_ref):
    # Encoder: H = tanh(X @ We + be)   (f32 accumulation on the MXU)
    h = jnp.tanh(
        jnp.dot(x_ref[...], we_ref[...], preferred_element_type=jnp.float32)
        + be_ref[...]
    )
    h_mm = h.astype(wd_ref.dtype)

    # Decoder: X_rec = tanh(H @ Wd + bd)
    xrec_ref[...] = jnp.tanh(
        jnp.dot(h_mm, wd_ref[...], preferred_element_type=jnp.float32)
        + bd_ref[...]
    ).astype(xrec_ref.dtype)

    # y head, lane-dense: contract on latent with H as the (N, K) operand so the
    # result lands as an (8, tile_b) block (row 0 holds the real head, rows 1-7
    # are zero weights).  Storing a (1, tile_b) row instead of a (tile_b, 128)
    # slab cuts the y HBM write bytes by 128x.
    yt = jax.lax.dot_general(
        wy_ref[...], h_mm,
        dimension_numbers=(((1,), (1,)), ((), ())),
        preferred_element_type=jnp.float32,
    )
    y_ref[...] = (yt[0:1, :] + by_ref[...]).astype(y_ref.dtype)


def ae_forward(x, params, *, max_tile_b=512, compute_dtype=None):
    """AE forward (decode=True path) as a single batch-tiled Pallas kernel.

    x: (B, input_dim) float32
    params (PyTorch convention):
      enc_w (latent, input), enc_b (latent,)
      dec_w (input, latent), dec_b (input,)
      y_w   (1, latent),     y_b   (1,)
    Returns (x_rec, y) with shapes (B, input_dim), (B, 1).
    """
    B, input_dim = x.shape
    latent_dim = params["enc_w"].shape[0]
    out_dtype = x.dtype
    cdt = jnp.dtype(out_dtype if compute_dtype is None else compute_dtype)

    input_pad = _round_up(input_dim, 128)
    latent_pad = _round_up(latent_dim, 128)

    # --- Weight prep: PyTorch (out,in) -> (in,out), zero-pad to lane multiples.
    we = jnp.zeros((input_pad, latent_pad), cdt)
    we = we.at[:input_dim, :latent_dim].set(params["enc_w"].T.astype(cdt))
    be = jnp.zeros((1, latent_pad), jnp.float32)
    be = be.at[0, :latent_dim].set(params["enc_b"].astype(jnp.float32))
    wd = jnp.zeros((latent_pad, input_pad), cdt)
    wd = wd.at[:latent_dim, :input_dim].set(params["dec_w"].T.astype(cdt))
    bd = jnp.zeros((1, input_pad), jnp.float32)
    bd = bd.at[0, :input_dim].set(params["dec_b"].astype(jnp.float32))
    wy = jnp.zeros((8, latent_pad), cdt)
    wy = wy.at[0, :latent_dim].set(params["y_w"][0].astype(cdt))
    by = params["y_b"].reshape(1, 1).astype(jnp.float32)

    # --- X: skip the HBM pad/copy when the feature dim is already lane-aligned.
    #     Keep the K zero-pad otherwise (unspecified K lanes would poison valid
    #     rows).  Batch raggedness is handled by Pallas block clipping instead
    #     of zero-padding B in HBM.
    if input_pad == input_dim and x.dtype == cdt:
        x_in = x
    else:
        x_in = jnp.zeros((B, input_pad), cdt).at[:, :input_dim].set(x.astype(cdt))

    # --- Honest VMEM accounting -> tile_b.
    csz, f32 = cdt.itemsize, 4
    fixed_bytes = (
        csz * (2 * input_pad * latent_pad + 8 * latent_pad)    # We, Wd, Wy (1 buf)
        + f32 * (latent_pad + input_pad + 128)                 # be, bd, by
    )
    per_row_bytes = (
        2 * csz * input_pad                       # x block (double-buffered)
        + 2 * f32 * input_pad                     # x_rec block (double-buffered)
        + 2 * f32                                 # y block (1, tile_b)
        + f32 * (latent_pad + input_pad + 8)      # h, pre-tanh decoder act, yt
    )
    capacity = _vmem_capacity_bytes()
    budget = capacity // 2                        # headroom for compiler scratch
    avail = budget - fixed_bytes
    cap = avail // per_row_bytes if avail > 0 else 0
    # TODO(synk): when resident weights alone approach VMEM (huge input_dim),
    # stream them with an extra K/N grid axis instead of shrinking the tile.
    cap = max(8, min(cap, max(8, (max_tile_b // 8) * 8)))
    cap = (cap // 8) * 8

    b8 = _round_up(B, 8)
    if b8 <= cap:
        if b8 >= 256 and cap >= 256:
            # >=2 grid steps so both v7x TensorCores get work under "parallel";
            # keep each tile >=128 rows (MXU-friendly, lane-aligned y block).
            tile_b = min((cap // 128) * 128, _round_up(_cdiv(B, 2), 128))
        else:
            tile_b = b8
    else:
        # Multi-tile: MXU/lane-friendly tiles, never 8-64-row tiles for large B.
        tile_b = (cap // 256) * 256 if cap >= 256 else 128
    n_tiles = _cdiv(B, tile_b)

    working_set = fixed_bytes + per_row_bytes * tile_b
    vmem_limit = int(working_set * 1.25) + (2 << 20)
    vmem_limit = max(vmem_limit, 16 << 20)
    vmem_limit = min(vmem_limit, int(capacity * 0.9))

    x_rec_full, y_row = pl.pallas_call(
        ae_forward_kernel,
        out_shape=(
            jax.ShapeDtypeStruct((B, input_pad), out_dtype),
            jax.ShapeDtypeStruct((1, n_tiles * tile_b), out_dtype),
        ),
        grid=(n_tiles,),
        in_specs=[
            pl.BlockSpec((tile_b, input_pad), lambda i: (i, 0)),   # X tile (streamed)
            _resident_spec((input_pad, latent_pad)),               # We
            _resident_spec((1, latent_pad)),                       # be
            _resident_spec((latent_pad, input_pad)),               # Wd
            _resident_spec((1, input_pad)),                        # bd
            _resident_spec((8, latent_pad)),                       # Wy (row 0 real)
            _resident_spec((1, 1)),                                # by
        ],
        out_specs=(
            pl.BlockSpec((tile_b, input_pad), lambda i: (i, 0)),   # X_rec tile
            pl.BlockSpec((1, tile_b), lambda i: (0, i)),           # y row (lane-dense)
        ),
        compiler_params=pltpu.CompilerParams(
            dimension_semantics=("parallel",),
            vmem_limit_bytes=int(vmem_limit),
        ),
    )(x_in, we, be, wd, bd, wy, by)

    x_rec = x_rec_full if input_pad == input_dim else x_rec_full[:, :input_dim]
    y = y_row[0, :B].reshape(B, 1)
    return x_rec, y


def init_params(key, input_dim, latent_dim):
    """Deterministic init matching the module's __init__ (xavier uniform/normal)."""
    k_enc, k_dec, k_y = jax.random.split(key, 3)

    def xavier_uniform(k, out_f, in_f):
        bound = math.sqrt(6.0 / (in_f + out_f))
        return jax.random.uniform(k, (out_f, in_f), jnp.float32, -bound, bound)

    def xavier_normal(k, out_f, in_f):
        std = math.sqrt(2.0 / (in_f + out_f))
        return std * jax.random.normal(k, (out_f, in_f), jnp.float32)

    return {
        "enc_w": xavier_uniform(k_enc, latent_dim, input_dim),
        "enc_b": jnp.zeros((latent_dim,), jnp.float32),
        "dec_w": xavier_uniform(k_dec, input_dim, latent_dim),
        "dec_b": jnp.zeros((input_dim,), jnp.float32),
        "y_w": xavier_normal(k_y, 1, latent_dim),
        "y_b": jnp.zeros((1,), jnp.float32),
    }


def _reference(x, params):
    h = jnp.tanh(x @ params["enc_w"].T + params["enc_b"])
    x_rec = jnp.tanh(h @ params["dec_w"].T + params["dec_b"])
    y = h @ params["y_w"].T + params["y_b"]
    return x_rec, y


if __name__ == "__main__":
    key = jax.random.PRNGKey(0)
    kx1, kx2, kx3, kp1, kp2 = jax.random.split(key, 5)

    # Case 1: tiny batch, lane-unaligned feature dims (K-pad path, single tile).
    input_dim, latent_dim = 32, 16
    params = init_params(kp1, input_dim, latent_dim)
    B1 = 8
    x1 = jax.random.normal(kx1, (B1, input_dim), jnp.float32)
    xr1, y1 = ae_forward(x1, params)
    jax.block_until_ready((xr1, y1))
    xr1_ref, y1_ref = _reference(x1, params)
    assert xr1.shape == (B1, input_dim) and y1.shape == (B1, 1)
    assert jnp.allclose(xr1, xr1_ref, atol=1e-5)
    assert jnp.allclose(y1, y1_ref, atol=1e-5)

    # Case 2: ragged multi-tile batch (128-row tiles, ragged last tile).
    B2 = 260
    x2 = jax.random.normal(kx2, (B2, input_dim), jnp.float32)
    xr2, y2 = ae_forward(x2, params, max_tile_b=128)
    jax.block_until_ready((xr2, y2))
    xr2_ref, y2_ref = _reference(x2, params)
    assert xr2.shape == (B2, input_dim) and y2.shape == (B2, 1)
    assert jnp.allclose(xr2, xr2_ref, atol=1e-5)
    assert jnp.allclose(y2, y2_ref, atol=1e-5)

    # Case 3: lane-aligned input_dim (no X copy / output slice), 2-way split tiles.
    input_dim3, latent_dim3 = 128, 64
    params3 = init_params(kp2, input_dim3, latent_dim3)
    B3 = 300
    x3 = jax.random.normal(kx3, (B3, input_dim3), jnp.float32)
    xr3, y3 = ae_forward(x3, params3)
    jax.block_until_ready((xr3, y3))
    xr3_ref, y3_ref = _reference(x3, params3)
    assert xr3.shape == (B3, input_dim3) and y3.shape == (B3, 1)
    assert jnp.allclose(xr3, xr3_ref, atol=1e-5)
    assert jnp.allclose(y3, y3_ref, atol=1e-5)

    print("KERNEL_OK")
</pallas_src>

<mosaic_0001>
module attributes {stable_mosaic.version = 11 : i64} {
  func.func @ae_forward_kernel(%arg0: i32, %arg1: memref<8x128xf32, #tpu.memory_space<vmem>>, %arg2: memref<128x128xf32, #tpu.memory_space<vmem>>, %arg3: memref<1x128xf32, #tpu.memory_space<vmem>>, %arg4: memref<128x128xf32, #tpu.memory_space<vmem>>, %arg5: memref<1x128xf32, #tpu.memory_space<vmem>>, %arg6: memref<8x128xf32, #tpu.memory_space<vmem>>, %arg7: memref<1x1xf32, #tpu.memory_space<vmem>>, %arg8: memref<8x128xf32, #tpu.memory_space<vmem>>, %arg9: memref<1x8xf32, #tpu.memory_space<vmem>>) attributes {dimension_semantics = [#tpu.dimension_semantics<parallel>], iteration_bounds = array<i64: 1>, scalar_prefetch = 0 : i64, scratch_operands = 0 : i64, tpu.core_type = #tpu.core_type<tc>, window_params = [{transform_indices = @transform_0, window_bounds = array<i64: 8, 128>}, {pipeline_mode = #tpu.pipeline_mode<synchronous>, transform_indices = @transform_1, window_bounds = array<i64: 128, 128>}, {pipeline_mode = #tpu.pipeline_mode<synchronous>, transform_indices = @transform_2, window_bounds = array<i64: 1, 128>}, {pipeline_mode = #tpu.pipeline_mode<synchronous>, transform_indices = @transform_3, window_bounds = array<i64: 128, 128>}, {pipeline_mode = #tpu.pipeline_mode<synchronous>, transform_indices = @transform_4, window_bounds = array<i64: 1, 128>}, {pipeline_mode = #tpu.pipeline_mode<synchronous>, transform_indices = @transform_5, window_bounds = array<i64: 8, 128>}, {pipeline_mode = #tpu.pipeline_mode<synchronous>, transform_indices = @transform_6, window_bounds = array<i64: 1, 1>}, {transform_indices = @transform_7, window_bounds = array<i64: 8, 128>}, {transform_indices = @transform_8, window_bounds = array<i64: 1, 8>}]} {
    %c0 = arith.constant 0 : index
    %c0_0 = arith.constant 0 : index
    %0 = vector.load %arg1[%c0, %c0_0] : memref<8x128xf32, #tpu.memory_space<vmem>>, vector<8x128xf32>
    %c0_1 = arith.constant 0 : index
    %c0_2 = arith.constant 0 : index
    %1 = vector.load %arg2[%c0_1, %c0_2] : memref<128x128xf32, #tpu.memory_space<vmem>>, vector<128x128xf32>
    %cst = arith.constant dense<0.000000e+00> : vector<8x128xf32>
    %2 = tpu.matmul %0, %1, %cst {dimension_numbers = #tpu.dot_dimension_numbers<[1], [0], [0], [1], [0, 0, 1, 1], [], []>} : vector<8x128xf32>, vector<128x128xf32>, vector<8x128xf32> -> vector<8x128xf32>
    %c0_3 = arith.constant 0 : index
    %c0_4 = arith.constant 0 : index
    %3 = vector.load %arg3[%c0_3, %c0_4] : memref<1x128xf32, #tpu.memory_space<vmem>>, vector<1x128xf32>
    %4 = vector.broadcast %3 : vector<1x128xf32> to vector<8x128xf32>
    %5 = arith.addf %2, %4 : vector<8x128xf32>
    %6 = math.tanh %5 : vector<8x128xf32>
    %c0_5 = arith.constant 0 : index
    %c0_6 = arith.constant 0 : index
    %7 = vector.load %arg4[%c0_5, %c0_6] : memref<128x128xf32, #tpu.memory_space<vmem>>, vector<128x128xf32>
    %cst_7 = arith.constant dense<0.000000e+00> : vector<8x128xf32>
    %8 = tpu.matmul %6, %7, %cst_7 {dimension_numbers = #tpu.dot_dimension_numbers<[1], [0], [0], [1], [0, 0, 1, 1], [], []>} : vector<8x128xf32>, vector<128x128xf32>, vector<8x128xf32> -> vector<8x128xf32>
    %c0_8 = arith.constant 0 : index
    %c0_9 = arith.constant 0 : index
    %9 = vector.load %arg5[%c0_8, %c0_9] : memref<1x128xf32, #tpu.memory_space<vmem>>, vector<1x128xf32>
    %10 = vector.broadcast %9 : vector<1x128xf32> to vector<8x128xf32>
    %11 = arith.addf %8, %10 : vector<8x128xf32>
    %12 = math.tanh %11 : vector<8x128xf32>
    %c0_10 = arith.constant 0 : index
    %c0_11 = arith.constant 0 : index
    %13 = vector.load %arg8[%c0_10, %c0_11] : memref<8x128xf32, #tpu.memory_space<vmem>>, vector<8x128xf32>
    tpu.vector_store %arg8[%c0_10, %c0_11], %12 {strides = array<i32>} : memref<8x128xf32, #tpu.memory_space<vmem>>, vector<8x128xf32>,
    %c0_12 = arith.constant 0 : index
    %c0_13 = arith.constant 0 : index
    %14 = vector.load %arg6[%c0_12, %c0_13] : memref<8x128xf32, #tpu.memory_space<vmem>>, vector<8x128xf32>
    %cst_14 = arith.constant dense<0.000000e+00> : vector<8x8xf32>
    %15 = tpu.matmul %14, %6, %cst_14 {dimension_numbers = #tpu.dot_dimension_numbers<[1], [1], [0], [0], [0, 0, 1, 0], [], []>} : vector<8x128xf32>, vector<8x128xf32>, vector<8x8xf32> -> vector<8x8xf32>
    %16 = vector.extract_strided_slice %15 {offsets = [0, 0], sizes = [1, 8], strides = [1, 1]} : vector<8x8xf32> to vector<1x8xf32>
    %c0_15 = arith.constant 0 : index
    %c0_16 = arith.constant 0 : index
    %17 = vector.load %arg7[%c0_15, %c0_16] : memref<1x1xf32, #tpu.memory_space<vmem>>, vector<1x1xf32>
    %18 = vector.broadcast %17 : vector<1x1xf32> to vector<1x8xf32>
    %19 = arith.addf %16, %18 : vector<1x8xf32>
    %c0_17 = arith.constant 0 : index
    %c0_18 = arith.constant 0 : index
    %20 = vector.load %arg9[%c0_17, %c0_18] : memref<1x8xf32, #tpu.memory_space<vmem>>, vector<1x8xf32>
    tpu.vector_store %arg9[%c0_17, %c0_18], %19 {strides = array<i32>} : memref<1x8xf32, #tpu.memory_space<vmem>>, vector<1x8xf32>,
    return
  }
  func.func @transform_0(%arg0: i32) -> (i32, i32) {
    %c0_i32 = arith.constant 0 : i32
    %c0_i32_0 = arith.constant 0 : i32
    return %arg0, %c0_i32 : i32, i32
  }
  func.func @transform_1(%arg0: i32) -> (i32, i32) {
    %c0_i32 = arith.constant 0 : i32
    %c0_i32_0 = arith.constant 0 : i32
    %c0_i32_1 = arith.constant 0 : i32
    return %c0_i32, %c0_i32_0 : i32, i32
  }
  func.func @transform_2(%arg0: i32) -> (i32, i32) {
    %c0_i32 = arith.constant 0 : i32
    %c0_i32_0 = arith.constant 0 : i32
    %c0_i32_1 = arith.constant 0 : i32
    return %c0_i32, %c0_i32_0 : i32, i32
  }
  func.func @transform_3(%arg0: i32) -> (i32, i32) {
    %c0_i32 = arith.constant 0 : i32
    %c0_i32_0 = arith.constant 0 : i32
    %c0_i32_1 = arith.constant 0 : i32
    return %c0_i32, %c0_i32_0 : i32, i32
  }
  func.func @transform_4(%arg0: i32) -> (i32, i32) {
    %c0_i32 = arith.constant 0 : i32
    %c0_i32_0 = arith.constant 0 : i32
    %c0_i32_1 = arith.constant 0 : i32
    return %c0_i32, %c0_i32_0 : i32, i32
  }
  func.func @transform_5(%arg0: i32) -> (i32, i32) {
    %c0_i32 = arith.constant 0 : i32
    %c0_i32_0 = arith.constant 0 : i32
    %c0_i32_1 = arith.constant 0 : i32
    return %c0_i32, %c0_i32_0 : i32, i32
  }
  func.func @transform_6(%arg0: i32) -> (i32, i32) {
    %c0_i32 = arith.constant 0 : i32
    %c0_i32_0 = arith.constant 0 : i32
    %c0_i32_1 = arith.constant 0 : i32
    return %c0_i32, %c0_i32_0 : i32, i32
  }
  func.func @transform_7(%arg0: i32) -> (i32, i32) {
    %c0_i32 = arith.constant 0 : i32
    %c0_i32_0 = arith.constant 0 : i32
    return %arg0, %c0_i32 : i32, i32
  }
  func.func @transform_8(%arg0: i32) -> (i32, i32) {
    %c0_i32 = arith.constant 0 : i32
    %c0_i32_0 = arith.constant 0 : i32
    return %c0_i32, %arg0 : i32, i32
  }
}

</mosaic_0001>

<bundles_post_ra>
// kernel: tpu_custom_call.1
= control target key start
LH: loop header
LB: loop body
LE: loop exit
PB: predicated region body
PF: predicated region fallthrough
CT: control target
= control target key end

     0   :  { %s732_s0 = inlined_call_operand.hbm [shape: f32[8,128], index: 0, kind: input, shape index: {}]   ;;  %s733_s1 = inlined_call_operand.hbm [shape: f32[128,128], index: 1, kind: input, shape index: {}]   ;;  %s734_s2 = inlined_call_operand.vmem [shape: f32[1,128], index: 2, kind: input, shape index: {}]   ;;  %s735_s3 = inlined_call_operand.hbm [shape: f32[128,128], index: 3, kind: input, shape index: {}]   ;;  %s736_s4 = inlined_call_operand.vmem [shape: f32[1,128], index: 4, kind: input, shape index: {}]   ;;  %s737_s5 = inlined_call_operand.vmem [shape: f32[8,128], index: 5, kind: input, shape index: {}]   ;;  %s738_s6 = inlined_call_operand.<no memory space> [shape: f32[1,1], index: 6, kind: input, shape index: {}]   ;;  %s739_s7 = inlined_call_operand.hbm [shape: f32[8,128], index: 7, kind: output, shape index: {0}]   ;;  %s740_s8 = inlined_call_operand.hbm [shape: f32[1,8], index: 8, kind: output, shape index: {1}]  }
   0x1   :  { %v14_v0 = vstv %s738_s6 }
   0x2   :  { %15 = vst [vmem:[#allocation2] sm:$0x1] %v14_v0 }
   0x3   :  { %16 = vsyncpa [#allocation4], 0 }
   0x4   :  { %17 = vsyncpa [#allocation7], 0 }
   0x5   :  { %18 = vsyncpa [#allocation5], 0 }
   0x6   :  { %19 = vsyncpa [#allocation11], 0  ;;  %s611_s29 = smov [#allocation6]  }
   0x7   :  { %s35_s30 = sshll.u32 %s611_s29, 4  ;;  %s36_s30 = int_to_ptr.vmem [resolvable:$true] %s35_s30 }
   0x8   :  { %s511_s9 = scalar_lea.vmem %s36_s30, 2048  ;;  %p516_p1 = scmp.lt.s32.totalorder %s36_s30, %s36_s30 }
   0x9   :  { %p512_p0 = scmp.ne.s32.totalorder %s36_s30, %s511_s9  ;;  %p517_p2 = scmp.lt.s32.totalorder %s511_s9, %s511_s9 }
   0xb   :  { %p518_p3 = por %p517_p2, %p516_p1 }
   0xd   :  { %p519_p4 = pnand %p518_p3, %p512_p0 }
   0xf   :  { %522 = shalt.err (!%p519_p4)
}
  0x10   :  { %s612_s10 = smov 128   ;;  %s613_s11 = smov 8  }
  0x11   :  { %41 = dma.hbm_to_vmem [thread:$0]  %s733_s1, 2048, %s36_s30, [#allocation7], %s612_s10, %s612_s10, %s613_s11  }
  0x12   :  { %s614_s6 = smov [#allocation3]   ;;  %s615_s15 = smov [#allocation8]  }
  0x13   :  { %s26_s14 = sshll.u32 %s614_s6, 4  ;;  %s49_s16 = sshll.u32 %s615_s15, 4  ;;  %s27_s14 = int_to_ptr.vmem [resolvable:$true] %s26_s14  ;;  %s50_s16 = int_to_ptr.vmem [resolvable:$true] %s49_s16 }
  0x14   :  { %s531_s17 = scalar_lea.vmem %s27_s14, 128  ;;  %p536_p6 = scmp.lt.s32.totalorder %s27_s14, %s27_s14 }
  0x15   :  { %p532_p5 = scmp.ne.s32.totalorder %s27_s14, %s531_s17  ;;  %p537_p7 = scmp.lt.s32.totalorder %s531_s17, %s531_s17 }
  0x17   :  { %p538_p8 = por %p537_p7, %p536_p6 }
  0x19   :  { %p539_p9 = pnand %p538_p8, %p532_p5 }
  0x1b   :  { %542 = shalt.err (!%p539_p9)
}
  0x1c   :  { %29 = dma.hbm_to_vmem [thread:$0]  %s732_s0, 128, %s27_s14, [#allocation4]  }
  0x1d   :  { %s551_s20 = scalar_lea.vmem %s50_s16, 2048  ;;  %p556_p11 = scmp.lt.s32.totalorder %s50_s16, %s50_s16 }
  0x1e   :  { %p552_p10 = scmp.ne.s32.totalorder %s50_s16, %s551_s20  ;;  %p557_p12 = scmp.lt.s32.totalorder %s551_s20, %s551_s20 }
  0x20   :  { %p558_p13 = por %p557_p12, %p556_p11 }
  0x22   :  { %p559_p0 = pnand %p558_p13, %p552_p10 }
  0x24   :  { %562 = shalt.err (!%p559_p0)
}
  0x25   :  { %55 = dma.hbm_to_vmem [thread:$0]  %s735_s3, 2048, %s50_s16, [#allocation7], %s612_s10, %s612_s10, %s613_s11  }
  0x26   :  { %603 = dma.done.wait [#allocation4], 128  }
  0x27   :  { %604 = vsyncadd [#allocation4], 4294967168 }
  0x28   :  { %605 = dma.done.wait [#allocation7], 4096  }
  0x29   :  { %606 = vsyncadd [#allocation7], 4294963200  ;;  %v616_v1 = vmov 0.0   ;;  %vm617_vm0 = vmmov 0   ;;  %v87_v2 = vld [vmem:[#allocation6 + $0x78] sm:$0xff]  ;;  %v86_v3 = vld [vmem:[#allocation6 + $0x70] sm:$0xff]  ;;  %v338_v43 = vlaneseq }
  0x2a   :  { %413 = vmatprep.subr.mxu0 %v616_v1  ;;  %445 = vmatprep.mubr.msk.f32.mxu0 %vm617_vm0, %v616_v1  ;;  %v85_v4 = vld [vmem:[#allocation6 + $0x68] sm:$0xff]  ;;  %v84_v5 = vld [vmem:[#allocation6 + $0x60] sm:$0xff]  ;;  %v181_v6 = vld [vmem:[#allocation8 + $0x78] sm:$0xff]  ;;  %v618_v36 = vmov 0   ;;  %vm343_vm1 = vcmask 57344  }
  0x2b   :  { %448 = vmatprep.subr.mxu1 %v616_v1  ;;  %480 = vmatprep.mubr.msk.f32.mxu1 %vm617_vm0, %v616_v1  ;;  %v83_v7 = vld [vmem:[#allocation6 + $0x58] sm:$0xff]  ;;  %v180_v8 = vld [vmem:[#allocation8 + $0x70] sm:$0xff]  ;;  %v179_v9 = vld [vmem:[#allocation8 + $0x68] sm:$0xff]  ;;  %v339_v44 = vshrl.u32 %v338_v43, 7 }
  0x2c   :  { %414 = vmatpush3.msra.mxu0 %v87_v2  ;;  %449 = vmatpush3.msra.mxu1 %v181_v6  ;;  %v82_v10 = vld [vmem:[#allocation6 + $0x50] sm:$0xff]  ;;  %v178_v11 = vld [vmem:[#allocation8 + $0x60] sm:$0xff]  ;;  %v81_v12 = vld [vmem:[#allocation6 + $0x48] sm:$0xff] }
  0x2d   :  { %415 = vmatprep.subr.mxu0 %v616_v1  ;;  %450 = vmatprep.subr.mxu1 %v616_v1  ;;  %v177_v13 = vld [vmem:[#allocation8 + $0x58] sm:$0xff]  ;;  %v80_v14 = vld [vmem:[#allocation6 + $0x40] sm:$0xff]  ;;  %v176_v15 = vld [vmem:[#allocation8 + $0x50] sm:$0xff]  ;;  %v340_v45 = vsub.s32 0, %v339_v44 }
  0x2e   :  { %416 = vmatpush3.msra.mxu0 %v86_v3  ;;  %451 = vmatpush3.msra.mxu1 %v180_v8  ;;  %v79_v16 = vld [vmem:[#allocation6 + $0x38] sm:$0xff]  ;;  %v175_v17 = vld [vmem:[#allocation8 + $0x48] sm:$0xff]  ;;  %v78_v18 = vld [vmem:[#allocation6 + $0x30] sm:$0xff] }
  0x2f   :  { %417 = vmatprep.subr.mxu0 %v616_v1  ;;  %452 = vmatprep.subr.mxu1 %v616_v1  ;;  %v77_v19 = vld [vmem:[#allocation6 + $0x28] sm:$0xff]  ;;  %v76_v20 = vld [vmem:[#allocation6 + $0x20] sm:$0xff]  ;;  %v75_v21 = vld [vmem:[#allocation6 + $0x18] sm:$0xff] }
  0x30   :  { %418 = vmatpush3.msra.mxu0 %v85_v4  ;;  %453 = vmatpush3.msra.mxu1 %v179_v9  ;;  %v74_v22 = vld [vmem:[#allocation6 + $0x10] sm:$0xff]  ;;  %v73_v23 = vld [vmem:[#allocation6 + $0x8] sm:$0xff]  ;;  %v72_v24 = vld [vmem:[#allocation6] sm:$0xff] }
  0x31   :  { %419 = vmatprep.subr.mxu0 %v616_v1  ;;  %454 = vmatprep.subr.mxu1 %v616_v1  ;;  %v71_v25 = vld [vmem:[#allocation3] sm:$0xff]  ;;  %v174_v26 = vld [vmem:[#allocation8 + $0x40] sm:$0xff]  ;;  %v172_v28 = vld [vmem:[#allocation8 + $0x30] sm:$0xff] }
  0x32   :  { %420 = vmatpush3.msra.mxu0 %v84_v5  ;;  %455 = vmatpush3.msra.mxu1 %v178_v11  ;;  %v173_v27 = vld [vmem:[#allocation8 + $0x38] sm:$0xff]  ;;  %v171_v29 = vld [vmem:[#allocation8 + $0x28] sm:$0xff]  ;;  %v170_v30 = vld [vmem:[#allocation8 + $0x20] sm:$0xff] }
  0x33   :  { %421 = vmatprep.subr.mxu0 %v616_v1  ;;  %456 = vmatprep.subr.mxu1 %v616_v1  ;;  %v169_v31 = vld [vmem:[#allocation8 + $0x18] sm:$0xff]  ;;  %v168_v32 = vld [vmem:[#allocation8 + $0x10] sm:$0xff]  ;;  %v167_v33 = vld [vmem:[#allocation8 + $0x8] sm:$0xff] }
  0x34   :  { %422 = vmatpush3.msra.mxu0 %v83_v7  ;;  %457 = vmatpush3.msra.mxu1 %v177_v13  ;;  %v166_v34 = vld [vmem:[#allocation8] sm:$0xff]  ;;  %v332_v35 = vld [vmem:[#allocation2] sm:$0x1] }
  0x35   :  { %423 = vmatprep.subr.mxu0 %v616_v1  ;;  %458 = vmatprep.subr.mxu1 %v616_v1  ;;  %v375_v37 = vld [vmem:[%s734_s2] ss:$0 sm:$0xff]  ;;  %s619_s2 = smov [#allocation10]  }
  0x36   :  { %424 = vmatpush3.msra.mxu0 %v82_v10  ;;  %459 = vmatpush3.msra.mxu1 %v176_v15  ;;  %v261_v42 = vld [vmem:[%s737_s5] sm:$0xff]  ;;  %s361_s26 = sshll.u32 %s619_s2, 4  ;;  %s362_s26 = int_to_ptr.vmem [resolvable:$true] %s361_s26 }
  0x37   :  { %425 = vmatprep.subr.mxu0 %v616_v1  ;;  %460 = vmatprep.subr.mxu1 %v616_v1  ;;  %v376_v47 = vld [vmem:[%s736_s4] ss:$0 sm:$0xff]  ;;  %s563_s5 = scalar_lea.vmem %s362_s26, 16  ;;  %s567_s27 = scalar_lea.vmem %s362_s26, 32 }
  0x38   :  { %426 = vmatpush3.msra.mxu0 %v81_v12  ;;  %461 = vmatpush3.msra.mxu1 %v175_v17  ;;  %p564_p1 = scmp.ne.s32.totalorder %s362_s26, %s563_s5  ;;  %p568_p2 = scmp.lt.s32.totalorder %s362_s26, %s362_s26 }
  0x39   :  { %427 = vmatprep.subr.mxu0 %v616_v1  ;;  %462 = vmatprep.subr.mxu1 %v616_v1  ;;  %p569_p3 = scmp.lt.s32.totalorder %s567_s27, %s563_s5 }
  0x3a   :  { %428 = vmatpush3.msra.mxu0 %v80_v14  ;;  %463 = vmatpush3.msra.mxu1 %v174_v26 }
  0x3b   :  { %429 = vmatprep.subr.mxu0 %v616_v1  ;;  %464 = vmatprep.subr.mxu1 %v616_v1  ;;  %p570_p4 = por %p569_p3, %p568_p2 }
  0x3c   :  { %430 = vmatpush3.msra.mxu0 %v79_v16  ;;  %465 = vmatpush3.msra.mxu1 %v173_v27 }
  0x3d   :  { %431 = vmatprep.subr.mxu0 %v616_v1  ;;  %466 = vmatprep.subr.mxu1 %v616_v1  ;;  %p571_p5 = pnand %p570_p4, %p564_p1 }
  0x3e   :  { %432 = vmatpush3.msra.mxu0 %v78_v18  ;;  %467 = vmatpush3.msra.mxu1 %v172_v28 }
  0x3f   :  { %433 = vmatprep.subr.mxu0 %v616_v1  ;;  %468 = vmatprep.subr.mxu1 %v616_v1 }
  0x40   :  { %434 = vmatpush3.msra.mxu0 %v77_v19  ;;  %469 = vmatpush3.msra.mxu1 %v171_v29 }
  0x41   :  { %435 = vmatprep.subr.mxu0 %v616_v1  ;;  %470 = vmatprep.subr.mxu1 %v616_v1 }
  0x42   :  { %436 = vmatpush3.msra.mxu0 %v76_v20  ;;  %471 = vmatpush3.msra.mxu1 %v170_v30 }
  0x43   :  { %437 = vmatprep.subr.mxu0 %v616_v1  ;;  %472 = vmatprep.subr.mxu1 %v616_v1 }
  0x44   :  { %438 = vmatpush3.msra.mxu0 %v75_v21  ;;  %473 = vmatpush3.msra.mxu1 %v169_v31 }
  0x45   :  { %439 = vmatprep.subr.mxu0 %v616_v1  ;;  %474 = vmatprep.subr.mxu1 %v616_v1 }
  0x46   :  { %440 = vmatpush3.msra.mxu0 %v74_v22  ;;  %475 = vmatpush3.msra.mxu1 %v168_v32 }
  0x47   :  { %441 = vmatprep.subr.mxu0 %v616_v1  ;;  %476 = vmatprep.subr.mxu1 %v616_v1 }
  0x48   :  { %442 = vmatpush3.msra.mxu0 %v73_v23  ;;  %477 = vmatpush3.msra.mxu1 %v167_v33 }
  0x49   :  { %443 = vmatprep.subr.mxu0 %v616_v1  ;;  %478 = vmatprep.subr.mxu1 %v616_v1 }
  0x4a   :  { %444 = vmatpush3.msra.mxu0 %v72_v24  ;;  %479 = vmatpush3.msra.mxu1 %v166_v34 }
  0x4b   :  { %446 = vmatmul.mubr.f32.vlgmr.msra.gmra.mxu0 %v71_v25  ;;  %483 = vmatprep.subr.mxu0 %v616_v1 }
  0x4c   :  { %485 = vmatprep.mubr.msk.f32.mxu0 %vm617_vm0, %v616_v1  ;;  %498 = vset.pattern.permute.xlu0 %v618_v36 }
  0x4d   :  { %335 = vperm.xlu0 %498, %v332_v35  }
  0xc8   :  { %v336_v46 = vpop.permute.xlu0 %335 }
  0xc9   :  { %v341_v49 = vrot.slane %v336_v46, %v340_v45 }
 0x10b   :  { %v161_v38 = vpop.f32.mrf.mxu0 }
 0x10c   :  { %v162_v39 = vadd.f32 %v375_v37, %v161_v38 }
 0x10d   :  { %v447_v40 = vpop.f32.mrf.mxu0 }
 0x10e   :  { %499 = vtanh.f32 %v162_v39 }
 0x11b   :  { %v500_v41 = vpop.eup %499 }
 0x11c   :  { %481 = vmatmul.mubr.f32.vlgmr.msra.gmra.mxu1 %v500_v41  ;;  %484 = vmatpush3.xpose.msra.mxu0 %v500_v41 }
 0x11f   :  { %486 = vmatmul.mubr.f32.vlgmr.msra.gmra.mxu0 %v261_v42 }
 0x1dc   :  { %v255_v48 = vpop.f32.mrf.mxu1 }
 0x1dd   :  { %v256_v50 = vadd.f32 %v376_v47, %v255_v48 }
 0x1de   :  { %v482_v51 = vpop.f32.mrf.mxu1 }
 0x1df   :  { %501 = vtanh.f32 %v256_v50  ;;  %v328_v52 = vpop.f32.mrf.mxu0 }
 0x1e0   :  { %v342_v53 = vadd.f32 %v341_v49, %v328_v52 }
 0x1e1   :  { %v487_v54 = vpop.f32.mrf.mxu0 }
 0x1e2   :  { %344 = vst.msk [vmem:[#allocation10] sm:$0x1] %vm343_vm1, %v342_v53 }
 0x1e3   :  { %574 = shalt.err (!%p571_p5)
}
 0x1e4   :  { %364 = dma.vmem_to_hbm [thread:$0]  %s362_s26, 16, %s740_s8, [#allocation11]  }
 0x1e5   :  { %s620_s29 = smov [#allocation9]  }
 0x1e6   :  { %s351_s30 = sshll.u32 %s620_s29, 4  ;;  %s352_s30 = int_to_ptr.vmem [resolvable:$true] %s351_s30 }
 0x1e7   :  { %s583_s9 = scalar_lea.vmem %s352_s30, 128  ;;  %p588_p7 = scmp.lt.s32.totalorder %s352_s30, %s352_s30 }
 0x1e8   :  { %p584_p6 = scmp.ne.s32.totalorder %s352_s30, %s583_s9  ;;  %p589_p8 = scmp.lt.s32.totalorder %s583_s9, %s583_s9 }
 0x1ea   :  { %p590_p9 = por %p589_p8, %p588_p7 }
 0x1ec   :  { %v502_v55 = vpop.eup %501  ;;  %p591_p10 = pnand %p590_p9, %p584_p6 }
 0x1ed   :  { %260 = vst [vmem:[#allocation9] sm:$0xff] %v502_v55 }
 0x1ee   :  { %594 = shalt.err (!%p591_p10)
}
 0x1ef   :  { %354 = dma.vmem_to_hbm [thread:$0]  %s352_s30, 128, %s739_s7, [#allocation5]  }
 0x1f0   :  { %607 = dma.done.wait [#allocation5], 128  }
 0x1f1   :  { %608 = vsyncadd [#allocation5], 4294967168 }
 0x1f2   :  { %609 = dma.done.wait [#allocation11], 16  }
 0x1f3   :  { %610 = vsyncadd [#allocation11], 4294967280 }
 0x1f4   :  { %371 = vsyncpa [#allocation4], 1 }
 0x1f5   :  { %372 = vsyncpa [#allocation7], 1 }
 0x1f6   :  { %373 = vsyncpa [#allocation5], 1 }
 0x1f7   :  { %374 = vsyncpa [#allocation11], 1 }

</bundles_post_ra>
